<compile_context>
chip_gen: v6e
topology: v6e:2x2x1
jax: 0.10.0
libtpu: 0.0.40
codegen_flags: <defaults>
</compile_context>

<pallas_src>
import math
import numpy as np
import jax
import jax.numpy as jnp
from jax.experimental import pallas as pl
from jax.experimental.pallas import tpu as pltpu


def _bilinear_weight_matrix(in_size, out_size, scale_factor):
    """Dense (out_size, in_size) weights matching F.interpolate(mode='bilinear',
    align_corners=False, recompute_scale_factor=None) along one axis, using the
    user-supplied scale_factor (PyTorch default behaviour)."""
    dst = np.arange(out_size, dtype=np.float64)
    src = (dst + 0.5) / float(scale_factor) - 0.5
    src = np.maximum(src, 0.0)
    i0 = np.minimum(np.floor(src).astype(np.int64), in_size - 1)
    i1 = np.minimum(i0 + 1, in_size - 1)
    w1 = np.clip(src - i0, 0.0, 1.0)
    w0 = 1.0 - w1
    m = np.zeros((out_size, in_size), dtype=np.float32)
    np.add.at(m, (np.arange(out_size), i0), w0)
    np.add.at(m, (np.arange(out_size), i1), w1)
    return m


def _choose_lane_dense_view(total):
    """Pick (rows, L) with rows*L == total and L % 128 == 0, preferring
    rows % 8 == 0 (fully unmasked sublane+lane stores). Returns None if total
    has no multiple-of-128 factor in [128, 1024]."""
    fallback = None
    for L in range(1024, 127, -128):
        if total % L == 0:
            rows = total // L
            if rows % 8 == 0:
                return rows, L
            if fallback is None:
                fallback = (rows, L)
    return fallback


def _pe_broadcast_add_kernel(emb_ref, pe_ref, out_ref):
    # emb_ref / out_ref: (BT, rows, L) slab covering BT batch elements.
    # pe_ref: (rows, L) positional encoding, resident across the whole grid.
    out_ref[...] = (emb_ref[...] + pe_ref[...][None]).astype(out_ref.dtype)


class PositionalEncodingPallas:
    def __init__(self, num_positions=64, embed_dim=768, key=None):
        if key is None:
            key = jax.random.PRNGKey(0)
        self.num_positions = num_positions
        self.embed_dim = embed_dim
        # deterministic stand-in for nn.Parameter(torch.randn(1, P, D))
        self.position_embedding = jax.random.normal(
            key, (1, num_positions, embed_dim), dtype=jnp.float32)

    def __call__(self, embeddings, height, width, donate_embeddings=False):
        B, S, D = embeddings.shape
        P = self.num_positions
        sqrt_p = int(round(P ** 0.5))
        assert sqrt_p * sqrt_p == P
        # torch's reshape (1, S, D) -> (1, sqrt_P, sqrt_P, D) requires S == P
        assert S == P, "sequence length must equal num_positions (torch reshape requires it)"

        C, H, W = sqrt_p, sqrt_p, D              # NCHW view: channels=sqrt_P, spatial=(sqrt_P, D)
        scale_h = height / P
        scale_w = width / P
        H_out = int(math.floor(H * scale_h))
        W_out = int(math.floor(W * scale_w))
        # torch's final .reshape(1, S, D) is valid iff C*H_out*W_out == S*D; both
        # sides of the add below use the SAME row-major flattening, so the
        # (rows, L) lane-dense view keeps pe and embeddings element-aligned.
        assert C * H_out * W_out == S * D, "shapes incompatible with final torch reshape"

        pos2d = self.position_embedding[0, :S, :]            # (P, D) == (C*H, W)

        # ---- one-time positional-encoding compute (tiny; plain XLA einsum) ----
        if height == P and width == P:
            # identity scale: interpolation is a no-op -> skip weights entirely
            pe_flat = pos2d.reshape(-1)
        else:
            A = jnp.asarray(_bilinear_weight_matrix(H, H_out, scale_h))    # (H_out, H)
            Bw = jnp.asarray(_bilinear_weight_matrix(W, W_out, scale_w))   # (W_out, W)
            patch = pos2d.reshape(C, H, W)
            pe = jnp.einsum('oh,chw,tw->cot', A, patch, Bw,
                            preferred_element_type=jnp.float32)            # (C, H_out, W_out)
            pe_flat = pe.reshape(-1)
        # hold pe in the embeddings dtype (smaller residency / per-step loads)
        pe_flat = pe_flat.astype(embeddings.dtype)

        # ---- lane-dense streaming view of the per-batch row-major flattening ----
        total = S * D
        view = _choose_lane_dense_view(total)
        if view is None:
            rows, L = S, D   # TODO(synk): lane-sparse fallback when S*D % 128 != 0
        else:
            rows, L = view
        emb_v = embeddings.reshape(B, rows, L)   # free row-major view in HBM
        pe_v = pe_flat.reshape(rows, L)

        # ---- several batch elements per grid step to amortize per-step overhead ----
        BT = min(B, 8)
        grid = (pl.cdiv(B, BT),)

        # ---- VMEM budget: in/out slabs double-buffered + resident pe (x2 buffers) ----
        esize = jnp.dtype(embeddings.dtype).itemsize
        needed = 4 * BT * rows * L * esize + 2 * rows * L * esize + (2 << 20)
        try:
            cap = int(pltpu.get_tpu_info().vmem_capacity_bytes * 3 // 4)
        except Exception:
            cap = 48 << 20   # safe on v7x (64 MiB physical per TC)
        vmem_limit = int(min(max(needed, 16 << 20), cap))

        out_v = pl.pallas_call(
            _pe_broadcast_add_kernel,
            out_shape=jax.ShapeDtypeStruct((B, rows, L), embeddings.dtype),
            grid=grid,
            in_specs=[
                pl.BlockSpec((BT, rows, L), lambda b: (b, 0, 0)),   # embeddings slab
                pl.BlockSpec((rows, L), lambda b: (0, 0)),          # pe (resident)
            ],
            out_specs=pl.BlockSpec((BT, rows, L), lambda b: (b, 0, 0)),
            compiler_params=pltpu.CompilerParams(
                dimension_semantics=("parallel",),                  # safe: no gated init
                vmem_limit_bytes=vmem_limit),
            input_output_aliases=({0: 0} if donate_embeddings else {}),
        )(emb_v, pe_v)

        return out_v.reshape(B, S, D)


if __name__ == "__main__":
    key = jax.random.PRNGKey(0)
    k_param, k_emb = jax.random.split(key)

    num_positions, embed_dim = 64, 32   # small shapes; P must be a perfect square
    batch, seq = 2, 64                  # seq == num_positions (required by the torch reshape)

    module = PositionalEncodingPallas(num_positions, embed_dim, key=k_param)
    embeddings = jax.random.normal(k_emb, (batch, seq, embed_dim), dtype=jnp.float32)

    # Case 1: height == width == num_positions -> identity interpolation
    out1 = module(embeddings, 64, 64)
    jax.block_until_ready(out1)
    ref1 = embeddings + module.position_embedding[:, :seq, :]
    assert out1.shape == (batch, seq, embed_dim)
    assert jnp.allclose(out1, ref1, atol=1e-5), "identity-scale check failed"

    # Case 2: non-trivial bilinear scale that still satisfies the final reshape
    # height=128 -> H: 8 -> 16 ; width=32 -> W: 32 -> 16 ; 8*16*16 == 64*32
    out2 = module(embeddings, 128, 32)
    jax.block_until_ready(out2)
    A = jnp.asarray(_bilinear_weight_matrix(8, 16, 128 / 64))
    Bw = jnp.asarray(_bilinear_weight_matrix(32, 16, 32 / 64))
    patch = module.position_embedding[0].reshape(8, 8, 32)
    interp = jnp.einsum('oh,chw,tw->cot', A, patch, Bw).reshape(1, seq, embed_dim)
    ref2 = embeddings + interp
    assert jnp.allclose(out2, ref2, atol=1e-4), "bilinear-scale check failed"

    print("KERNEL_OK")
</pallas_src>

<mosaic_0001>
module attributes {stable_mosaic.version = 11 : i64} {
  func.func @_pe_broadcast_add_kernel(%arg0: i32, %arg1: memref<2x8x256xf32, #tpu.memory_space<vmem>>, %arg2: memref<8x256xf32, #tpu.memory_space<vmem>>, %arg3: memref<2x8x256xf32, #tpu.memory_space<vmem>>) attributes {dimension_semantics = [#tpu.dimension_semantics<parallel>], iteration_bounds = array<i64: 1>, scalar_prefetch = 0 : i64, scratch_operands = 0 : i64, tpu.core_type = #tpu.core_type<tc>, window_params = [{transform_indices = @transform_0, window_bounds = array<i64: 2, 8, 256>}, {pipeline_mode = #tpu.pipeline_mode<synchronous>, transform_indices = @transform_1, window_bounds = array<i64: 8, 256>}, {transform_indices = @transform_2, window_bounds = array<i64: 2, 8, 256>}]} {
    %c0 = arith.constant 0 : index
    %c0_0 = arith.constant 0 : index
    %c0_1 = arith.constant 0 : index
    %0 = vector.load %arg1[%c0, %c0_0, %c0_1] : memref<2x8x256xf32, #tpu.memory_space<vmem>>, vector<2x8x256xf32>
    %c0_2 = arith.constant 0 : index
    %c0_3 = arith.constant 0 : index
    %1 = vector.load %arg2[%c0_2, %c0_3] : memref<8x256xf32, #tpu.memory_space<vmem>>, vector<8x256xf32>
    %2 = vector.shape_cast %1 : vector<8x256xf32> to vector<1x8x256xf32>
    %3 = vector.broadcast %2 : vector<1x8x256xf32> to vector<2x8x256xf32>
    %4 = arith.addf %0, %3 : vector<2x8x256xf32>
    %c0_4 = arith.constant 0 : index
    %c0_5 = arith.constant 0 : index
    %c0_6 = arith.constant 0 : index
    %5 = vector.load %arg3[%c0_4, %c0_5, %c0_6] : memref<2x8x256xf32, #tpu.memory_space<vmem>>, vector<2x8x256xf32>
    tpu.vector_store %arg3[%c0_4, %c0_5, %c0_6], %4 {strides = array<i32>} : memref<2x8x256xf32, #tpu.memory_space<vmem>>, vector<2x8x256xf32>,
    return
  }
  func.func @transform_0(%arg0: i32) -> (i32, i32, i32) {
    %c0_i32 = arith.constant 0 : i32
    %c0_i32_0 = arith.constant 0 : i32
    %c0_i32_1 = arith.constant 0 : i32
    return %arg0, %c0_i32, %c0_i32_0 : i32, i32, i32
  }
  func.func @transform_1(%arg0: i32) -> (i32, i32) {
    %c0_i32 = arith.constant 0 : i32
    %c0_i32_0 = arith.constant 0 : i32
    %c0_i32_1 = arith.constant 0 : i32
    return %c0_i32, %c0_i32_0 : i32, i32
  }
  func.func @transform_2(%arg0: i32) -> (i32, i32, i32) {
    %c0_i32 = arith.constant 0 : i32
    %c0_i32_0 = arith.constant 0 : i32
    %c0_i32_1 = arith.constant 0 : i32
    return %arg0, %c0_i32, %c0_i32_0 : i32, i32, i32
  }
}

</mosaic_0001>

<bundles_post_ra>
// kernel: tpu_custom_call.1
= control target key start
LH: loop header
LB: loop body
LE: loop exit
PB: predicated region body
PF: predicated region fallthrough
CT: control target
= control target key end

     0   :  { %7 = vsyncpa [#allocation3], 0  ;;  %s176_s0 = inlined_call_operand.hbm [shape: f32[2,8,256], index: 0, kind: input, shape index: {}]   ;;  %s177_s1 = inlined_call_operand.hbm [shape: f32[8,256], index: 1, kind: input, shape index: {}]   ;;  %s178_s2 = inlined_call_operand.hbm [shape: f32[2,8,256], index: 2, kind: output, shape index: {}]  }
   0x1   :  { %8 = vsyncpa [#allocation6], 0 }
   0x2   :  { %9 = vsyncpa [#allocation4], 0  ;;  %s141_s9 = smov [#allocation2]  }
   0x3   :  { %s15_s10 = sshll.u32 %s141_s9, 4  ;;  %s16_s10 = int_to_ptr.vmem [resolvable:$true] %s15_s10 }
   0x4   :  { %s83_s11 = scalar_lea.vmem %s16_s10, 512  ;;  %p88_p1 = scmp.lt.s32.totalorder %s16_s10, %s16_s10 }
   0x5   :  { %p84_p0 = scmp.ne.s32.totalorder %s16_s10, %s83_s11  ;;  %p89_p2 = scmp.lt.s32.totalorder %s83_s11, %s83_s11 }
   0x7   :  { %p90_p3 = por %p89_p2, %p88_p1 }
   0x9   :  { %p91_p4 = pnand %p90_p3, %p84_p0 }
   0xb   :  { %94 = shalt.err (!%p91_p4)
}
   0xc   :  { %s142_s12 = smov 256   ;;  %s143_s13 = smov 16  }
   0xd   :  { %21 = dma.hbm_to_vmem [thread:$0]  %s176_s0, 512, %s16_s10, [#allocation3], %s142_s12, %s142_s12, %s143_s13  }
   0xe   :  { %s144_s16 = smov [#allocation5]  }
   0xf   :  { %s28_s17 = sshll.u32 %s144_s16, 4  ;;  %s29_s17 = int_to_ptr.vmem [resolvable:$true] %s28_s17 }
  0x10   :  { %s103_s18 = scalar_lea.vmem %s29_s17, 256  ;;  %p108_p6 = scmp.lt.s32.totalorder %s29_s17, %s29_s17 }
  0x11   :  { %p104_p5 = scmp.ne.s32.totalorder %s29_s17, %s103_s18  ;;  %p109_p7 = scmp.lt.s32.totalorder %s103_s18, %s103_s18 }
  0x13   :  { %p110_p8 = por %p109_p7, %p108_p6 }
  0x15   :  { %p111_p9 = pnand %p110_p8, %p104_p5 }
  0x17   :  { %114 = shalt.err (!%p111_p9)
}
  0x18   :  { %31 = dma.hbm_to_vmem [thread:$0]  %s177_s1, 256, %s29_s17, [#allocation6]  }
  0x19   :  { %135 = dma.done.wait [#allocation3], 512  }
  0x1a   :  { %136 = vsyncadd [#allocation3], 4294966784 }
  0x1b   :  { %137 = dma.done.wait [#allocation6], 256  }
  0x1c   :  { %138 = vsyncadd [#allocation6], 4294967040  ;;  %s145_s21 = smov [#allocation7]   ;;  %v38_v0 = vld [vmem:[#allocation2] sm:$0xff]  ;;  %v39_v2 = vld [vmem:[#allocation2 + $0x8] sm:$0xff] }
  0x1d   :  { %s57_s0 = sshll.u32 %s145_s21, 4  ;;  %v42_v1 = vld [vmem:[#allocation5] sm:$0xff]  ;;  %v43_v4 = vld [vmem:[#allocation5 + $0x8] sm:$0xff]  ;;  %v40_v5 = vld [vmem:[#allocation2 + $0x10] sm:$0xff]  ;;  %s58_s0 = int_to_ptr.vmem [resolvable:$true] %s57_s0 }
  0x1e   :  { %v44_v3 = vadd.f32 %v42_v1, %v38_v0  ;;  %v41_v6 = vld [vmem:[#allocation2 + $0x18] sm:$0xff]  ;;  %v45_v7 = vadd.f32 %v43_v4, %v39_v2  ;;  %v46_v8 = vadd.f32 %v42_v1, %v40_v5  ;;  %s115_s1 = scalar_lea.vmem %s58_s0, 512  ;;  %p120_p11 = scmp.lt.s32.totalorder %s58_s0, %s58_s0 }
  0x1f   :  { %v47_v9 = vadd.f32 %v43_v4, %v41_v6  ;;  %p116_p10 = scmp.ne.s32.totalorder %s58_s0, %s115_s1  ;;  %p121_p12 = scmp.lt.s32.totalorder %s115_s1, %s115_s1 }
  0x20   :  { %48 = vst [vmem:[#allocation7] sm:$0xff] %v44_v3  ;;  %49 = vst [vmem:[#allocation7 + $0x8] sm:$0xff] %v45_v7 }
  0x21   :  { %50 = vst [vmem:[#allocation7 + $0x10] sm:$0xff] %v46_v8  ;;  %51 = vst [vmem:[#allocation7 + $0x18] sm:$0xff] %v47_v9  ;;  %p122_p13 = por %p121_p12, %p120_p11 }
  0x23   :  { %p123_p0 = pnand %p122_p13, %p116_p10 }
  0x25   :  { %126 = shalt.err (!%p123_p0)
}
  0x26   :  { %63 = dma.vmem_to_hbm [thread:$0]  %s58_s0, 512, %s178_s2, [#allocation4], %s142_s12, %s142_s12, %s143_s13  }
  0x27   :  { %139 = dma.done.wait [#allocation4], 512  }
  0x28   :  { %140 = vsyncadd [#allocation4], 4294966784 }
  0x29   :  { %67 = vsyncpa [#allocation3], 1 }
  0x2a   :  { %68 = vsyncpa [#allocation6], 1 }
  0x2b   :  { %69 = vsyncpa [#allocation4], 1 }

</bundles_post_ra>
